<compile_context>
chip_gen: v7x
topology: tpu7x:2x2x1
jax: 0.10.0
libtpu: 0.0.40
codegen_flags: <defaults>
</compile_context>

<pallas_src>
import functools

import jax
import jax.numpy as jnp
from jax.experimental import pallas as pl
from jax.experimental.pallas import tpu as pltpu

LANE = 128
DEFAULT_TILE_B = 128


def _round_up(n, m):
    return ((n + m - 1) // m) * m


def _ffn_kernel(activation_type, n_hidden, *refs):
    """refs = (x_ref, W0, b0, W1, b1, ..., W_fc2, b_fc2, out_ref).

    One (TILE_B, feat_pad) batch tile per grid step; all weights resident."""
    x_ref = refs[0]
    out_ref = refs[-1]
    params = refs[1:-1]

    h = x_ref[...]                              # bf16 (TILE_B, feat_pad)
    for k in range(n_hidden):
        w = params[2 * k][...]                  # bf16 (in_pad, out_pad)
        b = params[2 * k + 1][...]              # f32  (1, out_pad)
        a = jnp.dot(h, w, preferred_element_type=jnp.float32) + b
        if activation_type == "relu":
            a = jnp.maximum(a, 0.0)
        elif activation_type == "tanh":
            a = jnp.tanh(a)                     # EUP slot: ~free next to MXU work
        else:
            raise ValueError(f"unknown activation: {activation_type}")
        # TODO(synk): nn.Dropout is identity in eval mode; training-mode stochastic
        # dropout (pltpu.prng_random_bits + jnp.where) intentionally not implemented.
        h = a.astype(jnp.bfloat16)              # bf16 between layers, f32 accumulate

    w_fc2 = params[2 * n_hidden][...]           # bf16 (hidden_pad, ncls_pad)
    b_fc2 = params[2 * n_hidden + 1][...]       # f32  (1, ncls_pad)
    logits = jnp.dot(h, w_fc2, preferred_element_type=jnp.float32) + b_fc2
    out_ref[...] = logits.astype(out_ref.dtype)


def prepare_params(hidden_params, fc2_params):
    """One-time weight prep (hoisted out of the per-call hot path).

    Takes PyTorch-layout (out_dim, in_dim) weights and (out_dim,) biases,
    transposes to (in, out), zero-pads lane dims to multiples of 128, casts
    weights to bf16 (biases stay f32).  Returns (flat_params, padded_shapes)."""
    flat, shapes = [], []
    for w, b in list(hidden_params) + [fc2_params]:
        w = jnp.asarray(w, jnp.float32)
        b = jnp.asarray(b, jnp.float32)
        out_dim, in_dim = w.shape
        in_pad, out_pad = _round_up(in_dim, LANE), _round_up(out_dim, LANE)
        w_t = jnp.zeros((in_pad, out_pad), jnp.float32).at[:in_dim, :out_dim].set(w.T)
        b_p = jnp.zeros((1, out_pad), jnp.float32).at[0, :out_dim].set(b)
        flat.append(w_t.astype(jnp.bfloat16))   # bf16 weights feed the MXU
        flat.append(b_p)                        # f32 biases
        shapes.append((in_pad, out_pad))
    return flat, shapes


def feedforward_network(x, flat_params, shapes, activation_type, n_classes,
                        tile_b=DEFAULT_TILE_B):
    """x: (batch, n_features) f32.  flat_params/shapes from prepare_params()."""
    batch, n_features = x.shape
    n_hidden = len(shapes) - 1
    feat_pad = shapes[0][0]
    ncls_pad = shapes[-1][1]

    # Pad batch to a TILE_B multiple and features to the padded lane width.
    batch_pad = _round_up(max(batch, tile_b), tile_b)
    x_p = jnp.zeros((batch_pad, feat_pad), jnp.bfloat16)
    x_p = x_p.at[:batch, :n_features].set(x.astype(jnp.bfloat16))

    grid = (batch_pad // tile_b,)

    in_specs = [pl.BlockSpec((tile_b, feat_pad), lambda i: (i, 0))]
    for (in_pad, out_pad) in shapes:
        # Constant index_map: weights/biases stay resident in VMEM across the grid.
        in_specs.append(pl.BlockSpec((in_pad, out_pad), lambda i: (0, 0)))
        in_specs.append(pl.BlockSpec((1, out_pad), lambda i: (0, 0)))
    out_spec = pl.BlockSpec((tile_b, ncls_pad), lambda i: (i, 0))

    kernel = functools.partial(_ffn_kernel, activation_type, n_hidden)

    out_padded = pl.pallas_call(
        kernel,
        out_shape=jax.ShapeDtypeStruct((batch_pad, ncls_pad), jnp.float32),
        grid=grid,
        in_specs=in_specs,
        out_specs=out_spec,
        compiler_params=pltpu.CompilerParams(
            dimension_semantics=("parallel",),      # shard batch tiles across TCs (v7x)
            vmem_limit_bytes=64 * 1024 * 1024,      # budget against v7x's smaller VMEM
        ),
    )(x_p, *flat_params)

    return out_padded[:batch, :n_classes]


def _init_linear(key, out_dim, in_dim):
    """Deterministic init mimicking nn.Linear's uniform(-1/sqrt(in), 1/sqrt(in))."""
    kw, kb = jax.random.split(key)
    bound = 1.0 / jnp.sqrt(jnp.float32(in_dim))
    w = jax.random.uniform(kw, (out_dim, in_dim), jnp.float32, -bound, bound)
    b = jax.random.uniform(kb, (out_dim,), jnp.float32, -bound, bound)
    return w, b


def _reference_forward(x, hidden_params, fc2_params, activation_type):
    h = x
    for w, b in hidden_params:
        h = h @ w.T + b
        h = jnp.maximum(h, 0.0) if activation_type == "relu" else jnp.tanh(h)
    w, b = fc2_params
    return h @ w.T + b


if __name__ == "__main__":
    # Small shapes consistent with the module's forward: x is (batch, n_features).
    batch, n_features, hidden_size, n_classes, layers = 200, 32, 32, 8, 2

    key = jax.random.PRNGKey(0)
    keys = jax.random.split(key, layers + 2)

    hidden_params = []
    for k in range(layers):
        in_dim = n_features if k == 0 else hidden_size
        hidden_params.append(_init_linear(keys[k], hidden_size, in_dim))
    fc2_params = _init_linear(keys[layers], n_classes, hidden_size)

    x = jax.random.normal(keys[layers + 1], (batch, n_features), jnp.float32)

    # One-time parameter prep (transpose / pad / bf16 cast), hoisted out of forward.
    flat_params, shapes = prepare_params(hidden_params, fc2_params)

    for activation_type in ("relu", "tanh"):
        out = feedforward_network(x, flat_params, shapes, activation_type, n_classes)
        out = jax.block_until_ready(out)
        ref = _reference_forward(x, hidden_params, fc2_params, activation_type)
        assert out.shape == (batch, n_classes)
        # bf16 matmul inputs with f32 accumulation: loosened tolerance vs f32 reference.
        assert jnp.allclose(out, ref, atol=5e-2, rtol=5e-2), (
            f"mismatch for {activation_type}: "
            f"max abs err = {jnp.max(jnp.abs(out - ref))}")

    print("KERNEL_OK")
</pallas_src>

<mosaic_0001>
module attributes {stable_mosaic.version = 11 : i64} {
  func.func @_ffn_kernel(%arg0: i32, %arg1: memref<128x128xbf16, #tpu.memory_space<vmem>>, %arg2: memref<128x128xbf16, #tpu.memory_space<vmem>>, %arg3: memref<1x128xf32, #tpu.memory_space<vmem>>, %arg4: memref<128x128xbf16, #tpu.memory_space<vmem>>, %arg5: memref<1x128xf32, #tpu.memory_space<vmem>>, %arg6: memref<128x128xbf16, #tpu.memory_space<vmem>>, %arg7: memref<1x128xf32, #tpu.memory_space<vmem>>, %arg8: memref<128x128xf32, #tpu.memory_space<vmem>>) attributes {dimension_semantics = [#tpu.dimension_semantics<parallel>], iteration_bounds = array<i64: 2>, scalar_prefetch = 0 : i64, scratch_operands = 0 : i64, tpu.core_type = #tpu.core_type<tc>, window_params = [{transform_indices = @transform_0, window_bounds = array<i64: 128, 128>}, {pipeline_mode = #tpu.pipeline_mode<synchronous>, transform_indices = @transform_1, window_bounds = array<i64: 128, 128>}, {pipeline_mode = #tpu.pipeline_mode<synchronous>, transform_indices = @transform_2, window_bounds = array<i64: 1, 128>}, {pipeline_mode = #tpu.pipeline_mode<synchronous>, transform_indices = @transform_3, window_bounds = array<i64: 128, 128>}, {pipeline_mode = #tpu.pipeline_mode<synchronous>, transform_indices = @transform_4, window_bounds = array<i64: 1, 128>}, {pipeline_mode = #tpu.pipeline_mode<synchronous>, transform_indices = @transform_5, window_bounds = array<i64: 128, 128>}, {pipeline_mode = #tpu.pipeline_mode<synchronous>, transform_indices = @transform_6, window_bounds = array<i64: 1, 128>}, {transform_indices = @transform_7, window_bounds = array<i64: 128, 128>}]} {
    %c0 = arith.constant 0 : index
    %c0_0 = arith.constant 0 : index
    %0 = vector.load %arg1[%c0, %c0_0] : memref<128x128xbf16, #tpu.memory_space<vmem>>, vector<128x128xbf16>
    %c0_1 = arith.constant 0 : index
    %c0_2 = arith.constant 0 : index
    %1 = vector.load %arg2[%c0_1, %c0_2] : memref<128x128xbf16, #tpu.memory_space<vmem>>, vector<128x128xbf16>
    %c0_3 = arith.constant 0 : index
    %c0_4 = arith.constant 0 : index
    %2 = vector.load %arg3[%c0_3, %c0_4] : memref<1x128xf32, #tpu.memory_space<vmem>>, vector<1x128xf32>
    %cst = arith.constant dense<0.000000e+00> : vector<128x128xf32>
    %3 = tpu.matmul %0, %1, %cst {dimension_numbers = #tpu.dot_dimension_numbers<[1], [0], [0], [1], [0, 0, 1, 1], [], []>} : vector<128x128xbf16>, vector<128x128xbf16>, vector<128x128xf32> -> vector<128x128xf32>
    %4 = vector.broadcast %2 : vector<1x128xf32> to vector<128x128xf32>
    %5 = arith.addf %3, %4 : vector<128x128xf32>
    %cst_5 = arith.constant 0.000000e+00 : f32
    %6 = vector.broadcast %cst_5 : f32 to vector<128x128xf32>
    %7 = arith.maximumf %5, %6 : vector<128x128xf32>
    %8 = arith.truncf %7 : vector<128x128xf32> to vector<128x128xbf16>
    %c0_6 = arith.constant 0 : index
    %c0_7 = arith.constant 0 : index
    %9 = vector.load %arg4[%c0_6, %c0_7] : memref<128x128xbf16, #tpu.memory_space<vmem>>, vector<128x128xbf16>
    %c0_8 = arith.constant 0 : index
    %c0_9 = arith.constant 0 : index
    %10 = vector.load %arg5[%c0_8, %c0_9] : memref<1x128xf32, #tpu.memory_space<vmem>>, vector<1x128xf32>
    %cst_10 = arith.constant dense<0.000000e+00> : vector<128x128xf32>
    %11 = tpu.matmul %8, %9, %cst_10 {dimension_numbers = #tpu.dot_dimension_numbers<[1], [0], [0], [1], [0, 0, 1, 1], [], []>} : vector<128x128xbf16>, vector<128x128xbf16>, vector<128x128xf32> -> vector<128x128xf32>
    %12 = vector.broadcast %10 : vector<1x128xf32> to vector<128x128xf32>
    %13 = arith.addf %11, %12 : vector<128x128xf32>
    %cst_11 = arith.constant 0.000000e+00 : f32
    %14 = vector.broadcast %cst_11 : f32 to vector<128x128xf32>
    %15 = arith.maximumf %13, %14 : vector<128x128xf32>
    %16 = arith.truncf %15 : vector<128x128xf32> to vector<128x128xbf16>
    %c0_12 = arith.constant 0 : index
    %c0_13 = arith.constant 0 : index
    %17 = vector.load %arg6[%c0_12, %c0_13] : memref<128x128xbf16, #tpu.memory_space<vmem>>, vector<128x128xbf16>
    %c0_14 = arith.constant 0 : index
    %c0_15 = arith.constant 0 : index
    %18 = vector.load %arg7[%c0_14, %c0_15] : memref<1x128xf32, #tpu.memory_space<vmem>>, vector<1x128xf32>
    %cst_16 = arith.constant dense<0.000000e+00> : vector<128x128xf32>
    %19 = tpu.matmul %16, %17, %cst_16 {dimension_numbers = #tpu.dot_dimension_numbers<[1], [0], [0], [1], [0, 0, 1, 1], [], []>} : vector<128x128xbf16>, vector<128x128xbf16>, vector<128x128xf32> -> vector<128x128xf32>
    %20 = vector.broadcast %18 : vector<1x128xf32> to vector<128x128xf32>
    %21 = arith.addf %19, %20 : vector<128x128xf32>
    %c0_17 = arith.constant 0 : index
    %c0_18 = arith.constant 0 : index
    %22 = vector.load %arg8[%c0_17, %c0_18] : memref<128x128xf32, #tpu.memory_space<vmem>>, vector<128x128xf32>
    tpu.vector_store %arg8[%c0_17, %c0_18], %21 {strides = array<i32>} : memref<128x128xf32, #tpu.memory_space<vmem>>, vector<128x128xf32>,
    return
  }
  func.func @transform_0(%arg0: i32) -> (i32, i32) {
    %c0_i32 = arith.constant 0 : i32
    %c0_i32_0 = arith.constant 0 : i32
    return %arg0, %c0_i32 : i32, i32
  }
  func.func @transform_1(%arg0: i32) -> (i32, i32) {
    %c0_i32 = arith.constant 0 : i32
    %c0_i32_0 = arith.constant 0 : i32
    %c0_i32_1 = arith.constant 0 : i32
    return %c0_i32, %c0_i32_0 : i32, i32
  }
  func.func @transform_2(%arg0: i32) -> (i32, i32) {
    %c0_i32 = arith.constant 0 : i32
    %c0_i32_0 = arith.constant 0 : i32
    %c0_i32_1 = arith.constant 0 : i32
    return %c0_i32, %c0_i32_0 : i32, i32
  }
  func.func @transform_3(%arg0: i32) -> (i32, i32) {
    %c0_i32 = arith.constant 0 : i32
    %c0_i32_0 = arith.constant 0 : i32
    %c0_i32_1 = arith.constant 0 : i32
    return %c0_i32, %c0_i32_0 : i32, i32
  }
  func.func @transform_4(%arg0: i32) -> (i32, i32) {
    %c0_i32 = arith.constant 0 : i32
    %c0_i32_0 = arith.constant 0 : i32
    %c0_i32_1 = arith.constant 0 : i32
    return %c0_i32, %c0_i32_0 : i32, i32
  }
  func.func @transform_5(%arg0: i32) -> (i32, i32) {
    %c0_i32 = arith.constant 0 : i32
    %c0_i32_0 = arith.constant 0 : i32
    %c0_i32_1 = arith.constant 0 : i32
    return %c0_i32, %c0_i32_0 : i32, i32
  }
  func.func @transform_6(%arg0: i32) -> (i32, i32) {
    %c0_i32 = arith.constant 0 : i32
    %c0_i32_0 = arith.constant 0 : i32
    %c0_i32_1 = arith.constant 0 : i32
    return %c0_i32, %c0_i32_0 : i32, i32
  }
  func.func @transform_7(%arg0: i32) -> (i32, i32) {
    %c0_i32 = arith.constant 0 : i32
    %c0_i32_0 = arith.constant 0 : i32
    return %arg0, %c0_i32 : i32, i32
  }
}

</mosaic_0001>

<bundles_post_ra>
// kernel: tpu_custom_call.1
= control target key start
LH: loop header
LB: loop body
LE: loop exit
PB: predicated region body
PF: predicated region fallthrough
CT: control target
= control target key end

     0   :  { %12 = vsyncpa [#allocation3], 0  ;;  %s2256_s0 = inlined_call_operand.hbm [shape: bf16[256,128], index: 0, kind: input, shape index: {}]   ;;  %s2257_s1 = inlined_call_operand.hbm [shape: bf16[128,128], index: 1, kind: input, shape index: {}]   ;;  %s2258_s2 = inlined_call_operand.hbm [shape: f32[1,128], index: 2, kind: input, shape index: {}]   ;;  %s2259_s3 = inlined_call_operand.hbm [shape: bf16[128,128], index: 3, kind: input, shape index: {}]   ;;  %s2260_s4 = inlined_call_operand.hbm [shape: f32[1,128], index: 4, kind: input, shape index: {}]   ;;  %s2261_s5 = inlined_call_operand.hbm [shape: bf16[128,128], index: 5, kind: input, shape index: {}]   ;;  %s2262_s6 = inlined_call_operand.hbm [shape: f32[1,128], index: 6, kind: input, shape index: {}]   ;;  %s2263_s7 = inlined_call_operand.hbm [shape: f32[256,128], index: 7, kind: output, shape index: {}]  }
   0x1   :  { %14 = vsyncpa [#allocation3 + $0x1], 0 }
   0x2   :  { %15 = vsyncpa [#allocation6], 0 }
   0x3   :  { %16 = vsyncpa [#allocation9], 0 }
   0x4   :  { %17 = vsyncpa [#allocation12], 0 }
   0x5   :  { %18 = vsyncpa [#allocation4], 0 }
   0x6   :  { %20 = vsyncpa [#allocation4 + $0x1], 0  ;;  %s1853_s24 = smov 0   ;;  %s1855_s25 = smov 0  }
   0x7   :  { %s1857_s26 = smov 0   ;;  %s1859_s27 = smov 0  }
   0x8 LB: > { %s1801_s28 = smov [#allocation5]   ;;  %s1874_s30 = sadd.s32 4294967295, %s1799_s27   ;;  %s1799_s27 = sphi %s1859_s27, %s2291_s27   ;;  %s1795_s26 = sphi %s1857_s26, %s2290_s26   ;;  %s1791_s25 = sphi %s1855_s25, %s2289_s25   ;;  %s1787_s24 = sphi %s1853_s24, %s2288_s24  }
   0x9   : > { %s221_s29 = sshll.u32 %s1801_s28, 4  ;;  %p1158_p0 = scmp.ge.s32.totalorder %s1799_s27, 1  ;;  %s1879_s29 = int_to_ptr.vmem [resolvable:$true] %s221_s29 }
   0xa   : > { %p2264_p1 = scmp.eq.s32.totalorder %s1874_s30, 0  ;;  %p209_p2 = scmp.lt.s32.totalorder %s1799_s27, 3 }
   0xb   : > { %s1802_s9 = smov [#allocation8]   ;;  %s1803_s12 = smov [#allocation11]  }
   0xc   : > { %p1881_p3 = pnand %p1158_p0, %p209_p2  ;;  %s245_s10 = sshll.u32 %s1802_s9, 4  ;;  %s1894_s10 = int_to_ptr.vmem [resolvable:$true] %s245_s10 }
   0xd   : > { %s269_s13 = sshll.u32 %s1803_s12, 4  ;;  %s1523_s16 = scalar_lea.hbm %s2257_s1, 1024  ;;  %s1896_s13 = int_to_ptr.vmem [resolvable:$true] %s269_s13 }
   0xe   : > { %s2268_s8 = scalar_select %p1881_p3, 1, 0 }
   0xf   : > { %p1408_p5 = pneg %p1881_p3  ;;  %p1524_p7 = scmp.ne.s32.totalorder %s2257_s1, %s1523_s16 }
  0x10   : > { %p1530_p11 = scmp.lt.u32.totalorder %s1523_s16, %s2257_s1 }
  0x11   : > { %p1890_p6 = pnand %p1408_p5, %p2264_p1 }
  0x13   : > { %p1906_p8 = pneg %p1890_p6 }
  0x15   : > { %p1526_p9 = pnand %p1906_p8, %p1524_p7 }
  0x17   : > { %p1527_p10 = pneg %p1526_p9 }
  0x19   : > { %p1532_p12 = pnand %p1530_p11, %p1527_p10 }
  0x1b   : > { %1535 = shalt.err (!%p1532_p12)
}
  0x1c   : > { %s1536_s22 = scalar_lea.vmem %s1879_s29, 1024  ;;  %p1544_p5 = scmp.lt.s32.totalorder %s1879_s29, %s1879_s29 }
  0x1d   : > { %p1537_p13 = scmp.ne.s32.totalorder %s1879_s29, %s1536_s22  ;;  %p1545_p4 = scmp.lt.s32.totalorder %s1536_s22, %s1536_s22 }
  0x1f   : > { %p1539_p0 = pnand %p1537_p13, %p1906_p8  ;;  %p1546_p7 = por %p1545_p4, %p1544_p5 }
  0x21   : > { %p1540_p2 = pneg %p1539_p0 }
  0x23   : > { %p1547_p9 = pnand %p1546_p7, %p1540_p2 }
  0x25   : > { %1550 = shalt.err (!%p1547_p9)
}
  0x26   : > { %s2266_s23 = smov 64   ;;  %s1805_s28 = smov 4  }
  0x27   : > { %1411 = dma.hbm_to_vmem [thread:$0]  (!%p1890_p6), %s2257_s1, 1024, %s1879_s29, [#allocation6], %s2266_s23, %s2266_s23, %s1805_s28  }
  0x28   : > { %s1551_s16 = scalar_lea.hbm %s2259_s3, 1024 }
  0x29   : > { %p1552_p4 = scmp.ne.s32.totalorder %s2259_s3, %s1551_s16  ;;  %p1558_p12 = scmp.lt.u32.totalorder %s1551_s16, %s2259_s3 }
  0x2b   : > { %p1554_p10 = pnand %p1552_p4, %p1906_p8 }
  0x2d   : > { %p1555_p11 = pneg %p1554_p10 }
  0x2f   : > { %p1560_p13 = pnand %p1558_p12, %p1555_p11 }
  0x31   : > { %1563 = shalt.err (!%p1560_p13)
}
  0x32   : > { %s1564_s29 = scalar_lea.vmem %s1894_s10, 1024  ;;  %p1572_p7 = scmp.lt.s32.totalorder %s1894_s10, %s1894_s10 }
  0x33   : > { %p1565_p0 = scmp.ne.s32.totalorder %s1894_s10, %s1564_s29  ;;  %p1573_p9 = scmp.lt.s32.totalorder %s1564_s29, %s1564_s29 }
  0x35   : > { %p1567_p2 = pnand %p1565_p0, %p1906_p8  ;;  %p1574_p4 = por %p1573_p9, %p1572_p7 }
  0x37   : > { %p1568_p5 = pneg %p1567_p2 }
  0x39   : > { %p1575_p10 = pnand %p1574_p4, %p1568_p5 }
  0x3b   : > { %1578 = shalt.err (!%p1575_p10)
}
  0x3c   : > { %1417 = dma.hbm_to_vmem [thread:$0]  (!%p1890_p6), %s2259_s3, 1024, %s1894_s10, [#allocation9], %s2266_s23, %s2266_s23, %s1805_s28  }
  0x3d   : > { %s1579_s15 = scalar_lea.hbm %s2261_s5, 1024 }
  0x3e   : > { %p1580_p11 = scmp.ne.s32.totalorder %s2261_s5, %s1579_s15  ;;  %p1586_p0 = scmp.lt.u32.totalorder %s1579_s15, %s2261_s5 }
  0x40   : > { %p1582_p12 = pnand %p1580_p11, %p1906_p8 }
  0x42   : > { %p1583_p13 = pneg %p1582_p12 }
  0x44   : > { %p1588_p2 = pnand %p1586_p0, %p1583_p13 }
  0x46   : > { %1591 = shalt.err (!%p1588_p2)
}
  0x47   : > { %s1592_s10 = scalar_lea.vmem %s1896_s13, 1024  ;;  %p1600_p4 = scmp.lt.s32.totalorder %s1896_s13, %s1896_s13 }
  0x48   : > { %p1593_p5 = scmp.ne.s32.totalorder %s1896_s13, %s1592_s10  ;;  %p1601_p10 = scmp.lt.s32.totalorder %s1592_s10, %s1592_s10 }
  0x4a   : > { %p1595_p7 = pnand %p1593_p5, %p1906_p8  ;;  %p1602_p11 = por %p1601_p10, %p1600_p4 }
  0x4c   : > { %p1596_p9 = pneg %p1595_p7 }
  0x4e   : > { %p1603_p12 = pnand %p1602_p11, %p1596_p9 }
  0x50   : > { %1606 = shalt.err (!%p1603_p12)
}
  0x51   : > { %1423 = dma.hbm_to_vmem [thread:$0]  (!%p1890_p6), %s2261_s5, 1024, %s1896_s13, [#allocation12], %s2266_s23, %s2266_s23, %s1805_s28  }
  0x52   : > { %s1806_s22 = smov [#allocation7]   ;;  %s1807_s12 = smov [#allocation10]  }
  0x53   : > { %s235_s9 = sshll.u32 %s1806_s22, 4  ;;  %s259_s14 = sshll.u32 %s1807_s12, 4  ;;  %s236_s9 = int_to_ptr.vmem [resolvable:$true] %s235_s9  ;;  %s260_s14 = int_to_ptr.vmem [resolvable:$true] %s259_s14 }
  0x54   : > { %s1607_s17 = scalar_lea.hbm %s2258_s2, 16 }
  0x55   : > { %p1608_p13 = scmp.ne.s32.totalorder %s2258_s2, %s1607_s17  ;;  %p1614_p5 = scmp.lt.u32.totalorder %s1607_s17, %s2258_s2 }
  0x57   : > { %p1610_p0 = pnand %p1608_p13, %p1906_p8 }
  0x59   : > { %p1611_p2 = pneg %p1610_p0 }
  0x5b   : > { %p1616_p7 = pnand %p1614_p5, %p1611_p2 }
  0x5d   : > { %1619 = shalt.err (!%p1616_p7)
}
  0x5e   : > { %s1620_s13 = scalar_lea.vmem %s236_s9, 16  ;;  %s1627_s29 = scalar_lea.vmem %s236_s9, 32 }
  0x5f   : > { %p1621_p9 = scmp.ne.s32.totalorder %s236_s9, %s1620_s13  ;;  %p1628_p11 = scmp.lt.s32.totalorder %s236_s9, %s236_s9 }
  0x60   : > { %p1629_p12 = scmp.lt.s32.totalorder %s1627_s29, %s1620_s13 }
  0x61   : > { %p1623_p4 = pnand %p1621_p9, %p1906_p8 }
  0x62   : > { %p1630_p1 = por %p1629_p12, %p1628_p11 }
  0x63   : > { %p1624_p10 = pneg %p1623_p4 }
  0x65   : > { %p1631_p3 = pnand %p1630_p1, %p1624_p10 }
  0x67   : > { %1634 = shalt.err (!%p1631_p3)
}
  0x68   : > { %1414 = dma.hbm_to_vmem [thread:$0]  (!%p1890_p6), %s2258_s2, 16, %s236_s9, [#allocation6]  }
  0x69   : > { %s1635_s17 = scalar_lea.hbm %s2260_s4, 16 }
  0x6a   : > { %p1636_p13 = scmp.ne.s32.totalorder %s2260_s4, %s1635_s17  ;;  %p1642_p3 = scmp.lt.u32.totalorder %s1635_s17, %s2260_s4 }
  0x6c   : > { %p1638_p0 = pnand %p1636_p13, %p1906_p8 }
  0x6e   : > { %p1639_p1 = pneg %p1638_p0 }
  0x70   : > { %p1644_p2 = pnand %p1642_p3, %p1639_p1 }
  0x72   : > { %1647 = shalt.err (!%p1644_p2)
}
  0x73   : > { %s1648_s13 = scalar_lea.vmem %s260_s14, 16  ;;  %s1655_s9 = scalar_lea.vmem %s260_s14, 32 }
  0x74   : > { %p1649_p5 = scmp.ne.s32.totalorder %s260_s14, %s1648_s13  ;;  %p1656_p4 = scmp.lt.s32.totalorder %s260_s14, %s260_s14 }
  0x75   : > { %p1657_p10 = scmp.lt.s32.totalorder %s1655_s9, %s1648_s13 }
  0x76   : > { %p1651_p7 = pnand %p1649_p5, %p1906_p8 }
  0x77   : > { %p1658_p11 = por %p1657_p10, %p1656_p4 }
  0x78   : > { %p1652_p9 = pneg %p1651_p7 }
  0x7a   : > { %p1659_p12 = pnand %p1658_p11, %p1652_p9 }
  0x7c   : > { %1662 = shalt.err (!%p1659_p12)
}
  0x7d   : > { %1420 = dma.hbm_to_vmem [thread:$0]  (!%p1890_p6), %s2260_s4, 16, %s260_s14, [#allocation9]  }
  0x7e   : > { %s1808_s12 = smov [#allocation13]   ;;  %s1663_s18 = scalar_lea.hbm %s2262_s6, 16 }
  0x7f   : > { %s283_s15 = sshll.u32 %s1808_s12, 4  ;;  %p1664_p13 = scmp.ne.s32.totalorder %s2262_s6, %s1663_s18  ;;  %s284_s15 = int_to_ptr.vmem [resolvable:$true] %s283_s15 }
  0x80   : > { %p1670_p3 = scmp.lt.u32.totalorder %s1663_s18, %s2262_s6 }
  0x81   : > { %p1666_p0 = pnand %p1664_p13, %p1906_p8 }
  0x83   : > { %p1667_p1 = pneg %p1666_p0 }
  0x85   : > { %p1672_p2 = pnand %p1670_p3, %p1667_p1 }
  0x87   : > { %1675 = shalt.err (!%p1672_p2)
}
  0x88   : > { %s1676_s14 = scalar_lea.vmem %s284_s15, 16  ;;  %s1683_s9 = scalar_lea.vmem %s284_s15, 32 }
  0x89   : > { %p1677_p5 = scmp.ne.s32.totalorder %s284_s15, %s1676_s14  ;;  %p1684_p4 = scmp.lt.s32.totalorder %s284_s15, %s284_s15 }
  0x8a   : > { %p1685_p10 = scmp.lt.s32.totalorder %s1683_s9, %s1676_s14 }
  0x8b   : > { %p1679_p7 = pnand %p1677_p5, %p1906_p8 }
  0x8c   : > { %p1686_p11 = por %p1685_p10, %p1684_p4 }
  0x8d   : > { %p1680_p9 = pneg %p1679_p7 }
  0x8f   : > { %p1687_p12 = pnand %p1686_p11, %p1680_p9 }
  0x91   : > { %1690 = shalt.err (!%p1687_p12)
}
  0x92   : > { %1426 = dma.hbm_to_vmem [thread:$0]  (!%p1890_p6), %s2262_s6, 16, %s284_s15, [#allocation12]  }
  0x93   : > { %s1157_s19 = sadd.s32 4294967294, %s1799_s27   ;;  %s2038_s11 = sadd.s32 1, %s1799_s27  }
  0x94   : > { %s30_s12 = ssub.s32 %s1799_s27, %s2038_s11  ;;  %s33_s16 = sadd.s32 1, %s1795_s26 }
  0x95   : > { %p31_p8 = scmp.eq.s32.totalorder %s30_s12, 0  ;;  %p40_p13 = scmp.ne.s32.totalorder %s1795_s26, %s1791_s25 }
  0x96   : > { %p41_p0 = scmp.eq.s32.totalorder %s1799_s27, 0  ;;  %p46_p1 = scmp.ne.s32.totalorder %s1791_s25, %s1787_s24 }
  0x97   : > { %s2049_s17 = scalar_select %p31_p8, %s1795_s26, %s33_s16  }
  0x98   : > { %p2051_p3 = por %p41_p0, %p40_p13  ;;  %p2272_p2 = scmp.eq.s32.totalorder %s1874_s30, 0 }
  0x99   : > { %p196_p5 = scmp.eq.s32.totalorder %s1874_s30, 1  ;;  %p202_p7 = scmp.eq.s32.totalorder %s1157_s19, 1 }
  0x9a   : > { %p2057_p6 = por %p2272_p2, %p46_p1  ;;  %p1441_p9 = scmp.lt.s32.totalorder %s1799_s27, 2 }
  0x9b   : > { %s294_s20 = sand.u32 1, %s1795_s26   ;;  %p2064_p4 = por %p196_p5, %p40_p13 }
  0x9c   : > { %p2068_p10 = por %p202_p7, %p46_p1  ;;  %s1166_s13 = sshll.u32 %s294_s20, 6 }
  0x9d   : > { %s2274_s10 = scalar_select %p2064_p4, 1, 0 }
  0x9e   : > { %s2275_s21 = scalar_select %p2068_p10, 1, 0 }
  0x9f   : > { %s1218_s14 = sshll.u32 %s1799_s27, 10  ;;  %s298_s19 = scalar_lea.vmem [#allocation2], %s1166_s13 }
  0xa0   : > { %s2076_s22 = scalar_lea.hbm %s2256_s0, %s1218_s14  ;;  %s305_s12 = sshll.u32 %s298_s19, 4  ;;  %s2078_s12 = int_to_ptr.vmem [resolvable:$true] %s305_s12 }
  0xa1   : > { %p2082_p11 = pnand %p1441_p9, %p2051_p3  ;;  %s2086_s23 = scalar_lea.sflag [#allocation3], %s294_s20 }
  0xa2   : > { %s1691_s9 = scalar_lea.hbm %s2076_s22, 1024  ;;  %s1696_s18 = scalar_lea.hbm %s2256_s0, 2048 }
  0xa3   : > { %p1692_p12 = scmp.ne.s32.totalorder %s2076_s22, %s1691_s9  ;;  %p1693_p8 = pneg %p2082_p11 }
  0xa4   : > { %p1697_p1 = scmp.lt.u32.totalorder %s2076_s22, %s2256_s0  ;;  %p1698_p3 = scmp.lt.u32.totalorder %s1696_s18, %s1691_s9 }
  0xa5   : > { %p1694_p13 = pnand %p1693_p8, %p1692_p12  ;;  %p1700_p5 = scmp.lt.u32.totalorder %s1691_s9, %s2076_s22 }
  0xa6   : > { %p1699_p2 = por %p1698_p3, %p1697_p1 }
  0xa7   : > { %p1695_p0 = pneg %p1694_p13 }
  0xa8   : > { %p1701_p7 = por %p1700_p5, %p1699_p2 }
  0xaa   : > { %p1702_p9 = pnand %p1701_p7, %p1695_p0 }
  0xac   : > { %1705 = shalt.err (!%p1702_p9)
}
  0xad   : > { %s1706_s20 = scalar_lea.vmem %s2078_s12, 1024  ;;  %s1809_s13 = smov [#allocation2]  }
  0xae   : > { %p1707_p12 = scmp.ne.s32.totalorder %s2078_s12, %s1706_s20  ;;  %s1711_s14 = sshll.u32 %s1809_s13, 4  ;;  %s1712_s14 = int_to_ptr.vmem [resolvable:$false] %s1711_s14 }
  0xaf   : > { %s1713_s29 = scalar_lea.vmem %s1712_s14, 2048  ;;  %p1714_p4 = scmp.lt.s32.totalorder %s2078_s12, %s1712_s14 }
  0xb0   : > { %p1709_p13 = pnand %p1707_p12, %p1693_p8  ;;  %p1715_p1 = scmp.lt.s32.totalorder %s1713_s29, %s1706_s20 }
  0xb2   : > { %p1710_p10 = pneg %p1709_p13  ;;  %p1716_p3 = por %p1715_p1, %p1714_p4 }
  0xb4   : > { %p1717_p2 = pnand %p1716_p3, %p1710_p10 }
  0xb6   : > { %1720 = shalt.err (!%p1717_p2)
}
  0xb7   : > { %s2277_s9 = smov 64   ;;  %p2278_p8 = scmp.ne.s32.totalorder %s2268_s8, 0 }
  0xb8   : > { %1430 = dma.hbm_to_vmem [thread:$0]  (!%p2082_p11), %s2076_s22, 1024, %s2078_s12, %s2086_s23, %s2277_s9, %s2277_s9, %s1805_s28  }
  0xb9   : > { %317 = sbr.rel (%p2278_p8) target bundleno = 936 (0x3a8), region = 48  ;;  %s2120_s18 = sand.u32 (!%p2278_p8), 1, %s1791_s25  }
  0xba   : > { %s1170_s19 = sshll.u32 (!%p2278_p8), %s2120_s18, 6  ;;  %s320_s20 = scalar_lea.sflag (!%p2278_p8), [#allocation3], %s2120_s18 }
  0xbb   : > { %s2124_s13 = scalar_lea.vmem (!%p2278_p8), [#allocation2], %s1170_s19 }
  0xc0   : > { %1766 = dma.done.wait (%p2057_p6), %s320_s20, 1024  }
  0xc1   : > { %1768 = vsyncadd (%p2057_p6), %s320_s20, 4294966272  ;;  %p2279_p4 = scmp.eq.s32.totalorder %s1874_s30, 0 }
  0xc3   : > { %1770 = dma.done.wait (%p2279_p4), [#allocation6], 1040   ;;  %p2280_p10 = pmov %p2279_p4 }
  0xc4   : > { %p2281_p11 = pmov %p2279_p4 }
  0xc5   : > { %1772 = vsyncadd (%p2280_p10), [#allocation6], 4294966256 }
  0xc6   : > { %1774 = dma.done.wait (%p2281_p11), [#allocation9], 1040   ;;  %p2282_p0 = pmov %p2279_p4 }
  0xc8   : > { %1776 = vsyncadd (%p2282_p0), [#allocation9], 4294966256  ;;  %p2283_p5 = pmov %p2282_p0 }
  0xc9   : > { %p2284_p7 = pmov %p2282_p0 }
  0xca   : > { %1778 = dma.done.wait (%p2283_p5), [#allocation12], 1040  }
  0xcb   : > { %1780 = vsyncadd (%p2284_p7), [#allocation12], 4294966256  ;;  %v1491_v0 = vld [vmem:[#allocation5] sm:$0xff]   ;;  %v1492_v1 = vld [vmem:[#allocation5 + $0x8] sm:$0xff]   ;;  %s1177_s8 = sshll.u32 %s2120_s18, 7  ;;  %s1219_s28 = sshll.u32 %s1874_s30, 11 }
  0xcc   : > { %1268 = vmatprep.subr.bf16.mxu0 %v1491_v0  ;;  %v1493_v2 = vld [vmem:[#allocation5 + $0x10] sm:$0xff]   ;;  %v1494_v3 = vld [vmem:[#allocation5 + $0x18] sm:$0xff]   ;;  %v1499_v4 = vld [vmem:[%s2124_s13] sm:$0xff]   ;;  %s2187_s23 = scalar_lea.vmem [#allocation14], %s1177_s8  ;;  %s2207_s16 = scalar_lea.hbm %s2263_s7, %s1219_s28 }
  0xcd   : > { %1269 = vmatpush3.bf16.msra.mxu0 %v1491_v0  ;;  %1284 = vmatprep.mubr.bf16.mxu0 %v1499_v4  ;;  %v1495_v5 = vld [vmem:[#allocation5 + $0x20] sm:$0xff]   ;;  %v1496_v6 = vld [vmem:[#allocation5 + $0x28] sm:$0xff]   ;;  %v1497_v9 = vld [vmem:[#allocation5 + $0x30] sm:$0xff]   ;;  %s1027_s15 = sshll.u32 %s2187_s23, 4  ;;  %s1014_s30 = scalar_lea.sflag [#allocation4], %s2120_s18  ;;  %s2209_s15 = int_to_ptr.vmem [resolvable:$true] %s1027_s15 }
  0xce   : > { %1270 = vmatprep.subr.bf16.mxu0 %v1492_v1  ;;  %v1507_v7 = vld [vmem:[#allocation8] sm:$0xff]   ;;  %v1508_v8 = vld [vmem:[#allocation8 + $0x8] sm:$0xff]   ;;  %v1509_v10 = vld [vmem:[#allocation8 + $0x10] sm:$0xff]   ;;  %s1721_s14 = scalar_lea.vmem %s2209_s15, 2048  ;;  %p2285_p9 = scmp.ne.s32.totalorder %s2274_s10, 0 }
  0xcf   : > { %1300 = vmatprep.subr.bf16.mxu1 %v1507_v7  ;;  %v1498_v11 = vld [vmem:[#allocation5 + $0x38] sm:$0xff]   ;;  %v1511_v13 = vld [vmem:[#allocation8 + $0x20] sm:$0xff]   ;;  %v1501_v15 = vld [vmem:[%s2124_s13 + $0x10] sm:$0xff]   ;;  %p1722_p6 = scmp.ne.s32.totalorder %s2209_s15, %s1721_s14  ;;  %s1810_s29 = smov [#allocation14]  }
  0xd0   : > { %1301 = vmatpush3.bf16.msra.mxu1 %v1507_v7  ;;  %v1510_v12 = vld [vmem:[#allocation8 + $0x18] sm:$0xff]   ;;  %v1500_v14 = vld [vmem:[%s2124_s13 + $0x8] sm:$0xff]   ;;  %v1505_v20 = vld [vmem:[%s2124_s13 + $0x30] sm:$0xff]   ;;  %s1725_s9 = sshll.u32 %s1810_s29, 4  ;;  %s1726_s9 = int_to_ptr.vmem [resolvable:$false] %s1725_s9 }
  0xd1   : > { %1271 = vmatpush3.bf16.msra.mxu0 %v1492_v1  ;;  %1302 = vmatprep.subr.bf16.mxu1 %v1508_v8  ;;  %v1512_v16 = vld [vmem:[#allocation8 + $0x28] sm:$0xff]   ;;  %v1502_v17 = vld [vmem:[%s2124_s13 + $0x18] sm:$0xff]   ;;  %v1503_v18 = vld [vmem:[%s2124_s13 + $0x20] sm:$0xff]   ;;  %p1723_p12 = pnand %p1722_p6, %p2285_p9  ;;  %s1727_s19 = scalar_lea.vmem %s1726_s9, 4096 }
  0xd2   : > { %1272 = vmatprep.subr.bf16.mxu0 %v1493_v2  ;;  %v1504_v19 = vld [vmem:[%s2124_s13 + $0x28] sm:$0xff]   ;;  %v1506_v21 = vld [vmem:[%s2124_s13 + $0x38] sm:$0xff]   ;;  %v2162_v30 = vld [vmem:[#allocation7] ss:$0 sm:$0xff]  ;;  %p1728_p1 = scmp.lt.s32.totalorder %s2209_s15, %s1726_s9  ;;  %p1729_p3 = scmp.lt.s32.totalorder %s1727_s19, %s1721_s14 }
  0xd3   : > { %v1513_v22 = vld [vmem:[#allocation8 + $0x30] sm:$0xff]   ;;  %v1514_v23 = vld [vmem:[#allocation8 + $0x38] sm:$0xff]   ;;  %v1515_v24 = vld [vmem:[#allocation11] sm:$0xff]   ;;  %p1724_p13 = pneg %p1723_p12 }
  0xd4   : > { %1303 = vmatpush3.bf16.msra.mxu1 %v1508_v8  ;;  %v1516_v25 = vld [vmem:[#allocation11 + $0x8] sm:$0xff]   ;;  %v1517_v26 = vld [vmem:[#allocation11 + $0x10] sm:$0xff]   ;;  %v2150_v27 = vld [vmem:[#allocation11 + $0x18] sm:$0xff]   ;;  %p1730_p2 = por %p1729_p3, %p1728_p1 }
  0xd5   : > { %1273 = vmatpush3.bf16.msra.mxu0 %v1493_v2  ;;  %1304 = vmatprep.subr.bf16.mxu1 %v1509_v10  ;;  %v2153_v28 = vld [vmem:[#allocation11 + $0x20] sm:$0xff]   ;;  %v2157_v29 = vld [vmem:[#allocation11 + $0x28] sm:$0xff]  }
  0xd6   : > { %1274 = vmatprep.subr.bf16.mxu0 %v1494_v3  ;;  %p1731_p8 = pnand %p1730_p2, %p1724_p13 }
  0xd8   : > { %1305 = vmatpush3.bf16.msra.mxu1 %v1509_v10 }
  0xd9   : > { %1275 = vmatpush3.bf16.msra.mxu0 %v1494_v3  ;;  %1306 = vmatprep.subr.bf16.mxu1 %v1510_v12 }
  0xda   : > { %1276 = vmatprep.subr.bf16.mxu0 %v1495_v5 }
  0xdc   : > { %1307 = vmatpush3.bf16.msra.mxu1 %v1510_v12 }
  0xdd   : > { %1277 = vmatpush3.bf16.msra.mxu0 %v1495_v5  ;;  %1308 = vmatprep.subr.bf16.mxu1 %v1511_v13 }
  0xde   : > { %1278 = vmatprep.subr.bf16.mxu0 %v1496_v6 }
  0xe0   : > { %1309 = vmatpush3.bf16.msra.mxu1 %v1511_v13 }
  0xe1   : > { %1279 = vmatpush3.bf16.msra.mxu0 %v1496_v6  ;;  %1310 = vmatprep.subr.bf16.mxu1 %v1512_v16 }
  0xe2   : > { %1280 = vmatprep.subr.bf16.mxu0 %v1497_v9 }
  0xe4   : > { %1311 = vmatpush3.bf16.msra.mxu1 %v1512_v16 }
  0xe5   : > { %1281 = vmatpush3.bf16.msra.mxu0 %v1497_v9  ;;  %1312 = vmatprep.subr.bf16.mxu1 %v1513_v22 }
  0xe6   : > { %1282 = vmatprep.subr.bf16.mxu0 %v1498_v11 }
  0xe8   : > { %1313 = vmatpush3.bf16.msra.mxu1 %v1513_v22 }
  0xe9   : > { %1283 = vmatpush3.bf16.msra.mxu0 %v1498_v11  ;;  %1314 = vmatprep.subr.bf16.mxu1 %v1514_v23 }
  0xea   : > { %1332 = vmatprep.subr.bf16.mxu0 %v1515_v24 }
  0xec   : > { %1285 = vmatmul.mubr.bf16.vlgmr.msra.gmra.mrb[0].mxu0 %v1500_v14  ;;  %1315 = vmatpush3.bf16.msra.mxu1 %v1514_v23  ;;  %v1521_v23 = vld [vmem:[#allocation11 + $0x30] sm:$0xff]  }
  0xed   : > { %1288 = vmatprep.mubr.bf16.mxu0 %v1501_v15  ;;  %1364 = vmatprep.subr.bf16.mxu1 %v1515_v24 }
  0xee   : > { %1333 = vmatpush3.bf16.msra.mxu0 %v1515_v24 }
  0xef   : > { %1334 = vmatprep.subr.bf16.mxu0 %v1516_v25 }
  0xf2   : > { %1335 = vmatpush3.bf16.msra.mxu0 %v1516_v25 }
  0xf3   : > { %1336 = vmatprep.subr.bf16.mxu0 %v1517_v26 }
  0xf4   : > { %1289 = vmatmul.mubr.bf16.gmra.mrb[4].mxu0 %v1502_v17 }
  0xf5   : > { %1292 = vmatprep.mubr.bf16.mxu0 %v1503_v18 }
  0xf6   : > { %1337 = vmatpush3.bf16.msra.mxu0 %v1517_v26 }
  0xf7   : > { %1338 = vmatprep.subr.bf16.mxu0 %v2150_v27 }
  0xfa   : > { %1339 = vmatpush3.bf16.msra.mxu0 %v2150_v27 }
  0xfb   : > { %1340 = vmatprep.subr.bf16.mxu0 %v2153_v28 }
  0xfc   : > { %1293 = vmatmul.mubr.bf16.gmra.mrb[8].mxu0 %v1504_v19 }
  0xfd   : > { %1296 = vmatprep.mubr.bf16.mxu0 %v1505_v20 }
  0xfe   : > { %1341 = vmatpush3.bf16.msra.mxu0 %v2153_v28 }
  0xff   : > { %1342 = vmatprep.subr.bf16.mxu0 %v2157_v29 }
 0x102   : > { %1343 = vmatpush3.bf16.msra.mxu0 %v2157_v29 }
 0x103   : > { %1344 = vmatprep.subr.bf16.mxu0 %v1521_v23 }
 0x104   : > { %1297 = vmatmul.mubr.bf16.gmra.mrb[12].mxu0 %v1506_v21 }
 0x106   : > { %1345 = vmatpush3.bf16.msra.mxu0 %v1521_v23 }
 0x1bf   : > { %v1286_v31 = vpop.f32.mrb[0].mxu0 }
 0x1c0   : > { %v559_v32 = vadd.f32 %v1286_v31, %v2162_v30  ;;  %v550_v33 = vpop.f32.mrb[1].mxu0 }
 0x1c1   : > { %v551_v34 = vadd.f32 %v2162_v30, %v550_v33  ;;  %v1287_v35 = vpop.f32.mrb[2].mxu0 }
 0x1c2   : > { %v562_v36 = vadd.f32 %v1287_v35, %v2162_v30  ;;  %v553_v37 = vpop.f32.mrb[3].mxu0  ;;  %v615_v39 = vmax.f32 %v559_v32, 0.0 }
 0x1c3   : > { %v554_v38 = vadd.f32 %v2162_v30, %v553_v37  ;;  %v613_v41 = vmax.f32 %v551_v34, 0.0 }
 0x1c4   : > { %v616_v40 = vmax.f32 %v562_v36, 0.0 }
 0x1c5   : > { %v614_v42 = vmax.f32 %v554_v38, 0.0 }
 0x1c6   : > { %v630_v43 = vpack.c.bf16 %v616_v40, %v615_v39 }
 0x1c7   : > { %v1290_v44 = vpop.f32.mrb[4].mxu0  ;;  %v629_v45 = vpack.c.bf16 %v614_v42, %v613_v41 }
 0x1c8   : > { %v575_v46 = vadd.f32 %v1290_v44, %v2162_v30  ;;  %v566_v47 = vpop.f32.mrb[5].mxu0 }
 0x1c9   : > { %v567_v48 = vadd.f32 %v2162_v30, %v566_v47  ;;  %v1291_v49 = vpop.f32.mrb[6].mxu0  ;;  %1316 = vmatprep.mubr.bf16.mxu1 %v629_v45 }
 0x1ca   : > { %v578_v50 = vadd.f32 %v1291_v49, %v2162_v30  ;;  %v569_v51 = vpop.f32.mrb[7].mxu0  ;;  %1317 = vmatmul.mubr.bf16.vlgmr.msra.gmra.mrb[0].mxu1 %v630_v43  ;;  %v619_v53 = vmax.f32 %v575_v46, 0.0 }
 0x1cb   : > { %v570_v52 = vadd.f32 %v2162_v30, %v569_v51  ;;  %1372 = vmatpush3.bf16.msra.mxu1 %v1515_v24  ;;  %v617_v55 = vmax.f32 %v567_v48, 0.0  ;;  %v1522_v24 = vld [vmem:[#allocation11 + $0x38] sm:$0xff]  }
 0x1cc   : > { %v620_v54 = vmax.f32 %v578_v50, 0.0  ;;  %1365 = vmatprep.subr.bf16.mxu1 %v1516_v25  ;;  %1346 = vmatprep.subr.bf16.mxu0 %v1522_v24 }
 0x1cd   : > { %v618_v56 = vmax.f32 %v570_v52, 0.0  ;;  %1347 = vmatpush3.bf16.msra.mxu0 %v1522_v24 }
 0x1ce   : > { %v632_v57 = vpack.c.bf16 %v620_v54, %v619_v53 }
 0x1cf   : > { %v631_v58 = vpack.c.bf16 %v618_v56, %v617_v55  ;;  %v1294_v59 = vpop.f32.mrb[8].mxu0  ;;  %1373 = vmatpush3.bf16.msra.mxu1 %v1516_v25  ;;  %v1195_v25 = vld [vmem:[#allocation10] ss:$0 sm:$0xff] }
 0x1d0   : > { %v591_v60 = vadd.f32 %v1294_v59, %v2162_v30  ;;  %v582_v61 = vpop.f32.mrb[9].mxu0  ;;  %1366 = vmatprep.subr.bf16.mxu1 %v1517_v26 }
 0x1d1   : > { %v583_v62 = vadd.f32 %v2162_v30, %v582_v61  ;;  %v1295_v63 = vpop.f32.mrb[10].mxu0  ;;  %1320 = vmatprep.mubr.bf16.mxu1 %v631_v58 }
 0x1d2   : > { %v594_v0 = vadd.f32 %v1295_v63, %v2162_v30  ;;  %v585_v1 = vpop.f32.mrb[11].mxu0  ;;  %1321 = vmatmul.mubr.bf16.gmra.mrb[4].mxu1 %v632_v57  ;;  %v623_v3 = vmax.f32 %v591_v60, 0.0 }
 0x1d3   : > { %v586_v2 = vadd.f32 %v2162_v30, %v585_v1  ;;  %1374 = vmatpush3.bf16.msra.mxu1 %v1517_v26  ;;  %v621_v5 = vmax.f32 %v583_v62, 0.0 }
 0x1d4   : > { %v624_v4 = vmax.f32 %v594_v0, 0.0  ;;  %1367 = vmatprep.subr.bf16.mxu1 %v2150_v27 }
 0x1d5   : > { %v622_v6 = vmax.f32 %v586_v2, 0.0 }
 0x1d6   : > { %v634_v7 = vpack.c.bf16 %v624_v4, %v623_v3 }
 0x1d7   : > { %v633_v8 = vpack.c.bf16 %v622_v6, %v621_v5  ;;  %v1298_v9 = vpop.f32.mrb[12].mxu0  ;;  %1375 = vmatpush3.bf16.msra.mxu1 %v2150_v27 }
 0x1d8   : > { %v607_v10 = vadd.f32 %v1298_v9, %v2162_v30  ;;  %v598_v11 = vpop.f32.mrb[13].mxu0  ;;  %1368 = vmatprep.subr.bf16.mxu1 %v2153_v28 }
 0x1d9   : > { %v599_v12 = vadd.f32 %v2162_v30, %v598_v11  ;;  %v1299_v13 = vpop.f32.mrb[14].mxu0  ;;  %1324 = vmatprep.mubr.bf16.mxu1 %v633_v8 }
 0x1da   : > { %v610_v14 = vadd.f32 %v1299_v13, %v2162_v30  ;;  %v601_v15 = vpop.f32.mrb[15].mxu0  ;;  %1325 = vmatmul.mubr.bf16.gmra.mrb[8].mxu1 %v634_v7  ;;  %v627_v17 = vmax.f32 %v607_v10, 0.0 }
 0x1db   : > { %v602_v16 = vadd.f32 %v2162_v30, %v601_v15  ;;  %1376 = vmatpush3.bf16.msra.mxu1 %v2153_v28  ;;  %v625_v19 = vmax.f32 %v599_v12, 0.0 }
 0x1dc   : > { %v628_v18 = vmax.f32 %v610_v14, 0.0  ;;  %1369 = vmatprep.subr.bf16.mxu1 %v2157_v29 }
 0x1dd   : > { %v626_v20 = vmax.f32 %v602_v16, 0.0 }
 0x1de   : > { %v636_v21 = vpack.c.bf16 %v628_v18, %v627_v17  ;;  %v1204_v18 = vld [vmem:[#allocation13] ss:$0 sm:$0xff] }
 0x1df   : > { %v635_v22 = vpack.c.bf16 %v626_v20, %v625_v19  ;;  %1377 = vmatpush3.bf16.msra.mxu1 %v2157_v29 }
 0x1e0   : > { %1370 = vmatprep.subr.bf16.mxu1 %v1521_v23 }
 0x1e1   : > { %1328 = vmatprep.mubr.bf16.mxu1 %v635_v22 }
 0x1e2   : > { %1329 = vmatmul.mubr.bf16.gmra.mrb[12].mxu1 %v636_v21 }
 0x1e3   : > { %1378 = vmatpush3.bf16.msra.mxu1 %v1521_v23 }
 0x1e4   : > { %1371 = vmatprep.subr.bf16.mxu1 %v1522_v24 }
 0x1e7   : > { %1379 = vmatpush3.bf16.msra.mxu1 %v1522_v24 }
 0x29d   : > { %v1318_v26 = vpop.f32.mrb[0].mxu1 }
 0x29e   : > { %v751_v27 = vadd.f32 %v1318_v26, %v1195_v25  ;;  %v742_v28 = vpop.f32.mrb[1].mxu1 }
 0x29f   : > { %v743_v30 = vadd.f32 %v1195_v25, %v742_v28  ;;  %v1319_v31 = vpop.f32.mrb[2].mxu1 }
 0x2a0   : > { %v754_v32 = vadd.f32 %v1319_v31, %v1195_v25  ;;  %v745_v29 = vpop.f32.mrb[3].mxu1  ;;  %v807_v34 = vmax.f32 %v751_v27, 0.0 }
 0x2a1   : > { %v746_v33 = vadd.f32 %v1195_v25, %v745_v29  ;;  %v805_v36 = vmax.f32 %v743_v30, 0.0 }
 0x2a2   : > { %v808_v35 = vmax.f32 %v754_v32, 0.0 }
 0x2a3   : > { %v806_v37 = vmax.f32 %v746_v33, 0.0 }
 0x2a4   : > { %v822_v38 = vpack.c.bf16 %v808_v35, %v807_v34 }
 0x2a5   : > { %v821_v39 = vpack.c.bf16 %v806_v37, %v805_v36  ;;  %v1322_v40 = vpop.f32.mrb[4].mxu1 }
 0x2a6   : > { %v767_v41 = vadd.f32 %v1322_v40, %v1195_v25  ;;  %v758_v42 = vpop.f32.mrb[5].mxu1 }
 0x2a7   : > { %v759_v43 = vadd.f32 %v1195_v25, %v758_v42  ;;  %v1323_v44 = vpop.f32.mrb[6].mxu1  ;;  %1348 = vmatprep.mubr.bf16.mxu0 %v821_v39 }
 0x2a8   : > { %v770_v45 = vadd.f32 %v1323_v44, %v1195_v25  ;;  %v761_v46 = vpop.f32.mrb[7].mxu1  ;;  %1349 = vmatmul.mubr.bf16.vlgmr.msra.gmra.mrb[16].mxu0 %v822_v38  ;;  %v811_v48 = vmax.f32 %v767_v41, 0.0 }
 0x2a9   : > { %v762_v47 = vadd.f32 %v1195_v25, %v761_v46  ;;  %v809_v50 = vmax.f32 %v759_v43, 0.0 }
 0x2aa   : > { %v812_v49 = vmax.f32 %v770_v45, 0.0 }
 0x2ab   : > { %v810_v51 = vmax.f32 %v762_v47, 0.0 }
 0x2ac   : > { %v824_v52 = vpack.c.bf16 %v812_v49, %v811_v48 }
 0x2ad   : > { %v823_v53 = vpack.c.bf16 %v810_v51, %v809_v50  ;;  %v1326_v54 = vpop.f32.mrb[8].mxu1 }
 0x2ae   : > { %v783_v55 = vadd.f32 %v1326_v54, %v1195_v25  ;;  %v774_v56 = vpop.f32.mrb[9].mxu1 }
 0x2af   : > { %v775_v57 = vadd.f32 %v1195_v25, %v774_v56  ;;  %v1327_v58 = vpop.f32.mrb[10].mxu1  ;;  %1352 = vmatprep.mubr.bf16.mxu0 %v823_v53 }
 0x2b0   : > { %v786_v59 = vadd.f32 %v1327_v58, %v1195_v25  ;;  %v777_v60 = vpop.f32.mrb[11].mxu1  ;;  %1353 = vmatmul.mubr.bf16.gmra.mrb[20].mxu0 %v824_v52  ;;  %v815_v62 = vmax.f32 %v783_v55, 0.0 }
 0x2b1   : > { %v778_v61 = vadd.f32 %v1195_v25, %v777_v60  ;;  %v813_v0 = vmax.f32 %v775_v57, 0.0 }
 0x2b2   : > { %v816_v63 = vmax.f32 %v786_v59, 0.0 }
 0x2b3   : > { %v814_v1 = vmax.f32 %v778_v61, 0.0 }
 0x2b4   : > { %v826_v2 = vpack.c.bf16 %v816_v63, %v815_v62 }
 0x2b5   : > { %v825_v3 = vpack.c.bf16 %v814_v1, %v813_v0  ;;  %v1330_v4 = vpop.f32.mrb[12].mxu1 }
 0x2b6   : > { %v799_v5 = vadd.f32 %v1330_v4, %v1195_v25  ;;  %v790_v6 = vpop.f32.mrb[13].mxu1 }
 0x2b7   : > { %v791_v7 = vadd.f32 %v1195_v25, %v790_v6  ;;  %v1331_v8 = vpop.f32.mrb[14].mxu1  ;;  %1356 = vmatprep.mubr.bf16.mxu1 %v825_v3 }
 0x2b8   : > { %v802_v9 = vadd.f32 %v1331_v8, %v1195_v25  ;;  %v793_v10 = vpop.f32.mrb[15].mxu1  ;;  %1357 = vmatmul.mubr.bf16.vlgmr.msra.gmra.mrb[16].mxu1 %v826_v2  ;;  %v819_v12 = vmax.f32 %v799_v5, 0.0 }
 0x2b9   : > { %v794_v11 = vadd.f32 %v1195_v25, %v793_v10  ;;  %v817_v14 = vmax.f32 %v791_v7, 0.0 }
 0x2ba   : > { %v820_v13 = vmax.f32 %v802_v9, 0.0 }
 0x2bb   : > { %v818_v15 = vmax.f32 %v794_v11, 0.0 }
 0x2bc   : > { %v828_v16 = vpack.c.bf16 %v820_v13, %v819_v12 }
 0x2bd   : > { %v827_v17 = vpack.c.bf16 %v818_v15, %v817_v14 }
 0x2bf   : > { %1360 = vmatprep.mubr.bf16.mxu1 %v827_v17 }
 0x2c0   : > { %1361 = vmatmul.mubr.bf16.gmra.mrb[20].mxu1 %v828_v16 }
 0x37b   : > { %v1350_v19 = vpop.f32.mrb[16].mxu0 }
 0x37c   : > { %v943_v20 = vadd.f32 %v1350_v19, %v1204_v18  ;;  %v934_v21 = vpop.f32.mrb[17].mxu0 }
 0x37d   : > { %v935_v22 = vadd.f32 %v1204_v18, %v934_v21  ;;  %v1351_v23 = vpop.f32.mrb[18].mxu0 }
 0x37e   : > { %999 = vst [vmem:[%s2187_s23 + $0x10] sm:$0xff] %v943_v20  ;;  %v946_v24 = vadd.f32 %v1351_v23, %v1204_v18  ;;  %v937_v25 = vpop.f32.mrb[19].mxu0 }
 0x37f   : > { %997 = vst [vmem:[%s2187_s23] sm:$0xff] %v935_v22  ;;  %v938_v26 = vadd.f32 %v1204_v18, %v937_v25 }
 0x380   : > { %1000 = vst [vmem:[%s2187_s23 + $0x18] sm:$0xff] %v946_v24 }
 0x381   : > { %998 = vst [vmem:[%s2187_s23 + $0x8] sm:$0xff] %v938_v26 }
 0x383   : > { %v1354_v27 = vpop.f32.mrb[20].mxu0 }
 0x384   : > { %v959_v28 = vadd.f32 %v1354_v27, %v1204_v18  ;;  %v950_v30 = vpop.f32.mrb[21].mxu0 }
 0x385   : > { %v951_v31 = vadd.f32 %v1204_v18, %v950_v30  ;;  %v1355_v32 = vpop.f32.mrb[22].mxu0 }
 0x386   : > { %1003 = vst [vmem:[%s2187_s23 + $0x30] sm:$0xff] %v959_v28  ;;  %v962_v29 = vadd.f32 %v1355_v32, %v1204_v18  ;;  %v953_v33 = vpop.f32.mrb[23].mxu0 }
 0x387   : > { %1001 = vst [vmem:[%s2187_s23 + $0x20] sm:$0xff] %v951_v31  ;;  %v954_v34 = vadd.f32 %v1204_v18, %v953_v33 }
 0x388   : > { %1004 = vst [vmem:[%s2187_s23 + $0x38] sm:$0xff] %v962_v29 }
 0x389   : > { %1002 = vst [vmem:[%s2187_s23 + $0x28] sm:$0xff] %v954_v34 }
 0x38b   : > { %v1358_v35 = vpop.f32.mrb[16].mxu1 }
 0x38c   : > { %v975_v36 = vadd.f32 %v1358_v35, %v1204_v18  ;;  %v966_v37 = vpop.f32.mrb[17].mxu1 }
 0x38d   : > { %v967_v38 = vadd.f32 %v1204_v18, %v966_v37  ;;  %v1359_v39 = vpop.f32.mrb[18].mxu1 }
 0x38e   : > { %1007 = vst [vmem:[%s2187_s23 + $0x50] sm:$0xff] %v975_v36  ;;  %v978_v40 = vadd.f32 %v1359_v39, %v1204_v18  ;;  %v969_v41 = vpop.f32.mrb[19].mxu1 }
 0x38f   : > { %1005 = vst [vmem:[%s2187_s23 + $0x40] sm:$0xff] %v967_v38  ;;  %v970_v42 = vadd.f32 %v1204_v18, %v969_v41 }
 0x390   : > { %1008 = vst [vmem:[%s2187_s23 + $0x58] sm:$0xff] %v978_v40 }
 0x391   : > { %1006 = vst [vmem:[%s2187_s23 + $0x48] sm:$0xff] %v970_v42 }
 0x393   : > { %v1362_v43 = vpop.f32.mrb[20].mxu1 }
 0x394   : > { %v991_v44 = vadd.f32 %v1362_v43, %v1204_v18  ;;  %v982_v45 = vpop.f32.mrb[21].mxu1 }
 0x395   : > { %v983_v46 = vadd.f32 %v1204_v18, %v982_v45  ;;  %v1363_v47 = vpop.f32.mrb[22].mxu1 }
 0x396   : > { %1011 = vst [vmem:[%s2187_s23 + $0x70] sm:$0xff] %v991_v44  ;;  %v994_v48 = vadd.f32 %v1363_v47, %v1204_v18  ;;  %v985_v49 = vpop.f32.mrb[23].mxu1 }
 0x397   : > { %1009 = vst [vmem:[%s2187_s23 + $0x60] sm:$0xff] %v983_v46  ;;  %v986_v50 = vadd.f32 %v1204_v18, %v985_v49 }
 0x398   : > { %1012 = vst [vmem:[%s2187_s23 + $0x78] sm:$0xff] %v994_v48 }
 0x399   : > { %1010 = vst [vmem:[%s2187_s23 + $0x68] sm:$0xff] %v986_v50 }
 0x39a   : > { %1734 = shalt.err (!%p1731_p8)
}
 0x39b   : > { %s1735_s20 = scalar_lea.hbm %s2207_s16, 2048  ;;  %s1739_s23 = scalar_lea.hbm %s2263_s7, 4096 }
 0x39c   : > { %p1736_p4 = scmp.ne.s32.totalorder %s2207_s16, %s1735_s20  ;;  %p1740_p0 = scmp.lt.u32.totalorder %s2207_s16, %s2263_s7 }
 0x39d   : > { %p1741_p5 = scmp.lt.u32.totalorder %s1739_s23, %s1735_s20  ;;  %p1743_p6 = scmp.lt.u32.totalorder %s1735_s20, %s2207_s16 }
 0x39e   : > { %p1737_p10 = pnand %p1736_p4, %p2285_p9 }
 0x39f   : > { %p1742_p7 = por %p1741_p5, %p1740_p0 }
 0x3a0   : > { %p1738_p11 = pneg %p1737_p10 }
 0x3a1   : > { %p1744_p12 = por %p1743_p6, %p1742_p7 }
 0x3a3   : > { %p1745_p13 = pnand %p1744_p12, %p1738_p11 }
 0x3a5   : > { %1748 = shalt.err (!%p1745_p13)
}
 0x3a6   : > { %s1811_s12 = smov 128   ;;  %s1812_s14 = smov 8  }
 0x3a7   : > { %1406 = dma.vmem_to_hbm [thread:$0]  (%p2285_p9), %s2209_s15, 2048, %s2207_s16, %s1014_s30, %s1811_s12, %s1811_s12, %s1812_s14  }
 0x3a8 PF: > { %s1042_s29 = sand.u32 1, %s1787_s24   ;;  %p2286_p1 = scmp.ne.s32.totalorder %s2275_s21, 0 }
 0x3a9   : > { %p2287_p3 = scmp.ge.s32.totalorder %s1799_s27, 2  ;;  %s1043_s9 = scalar_lea.sflag [#allocation4], %s1042_s29 }
 0x3ab   : > { %p1432_p2 = pnand %p2287_p3, %p2286_p1 }
 0x3ad   : > { %1782 = dma.done.wait (!%p1432_p2), %s1043_s9, 2048  }
 0x3ae   : > { %1784 = vsyncadd (!%p1432_p2), %s1043_s9, 4294965248  ;;  %p23_p8 = scmp.ge.s32.totalorder %s2038_s11, 4   ;;  %s2288_s24 = smov %s1791_s25 }
 0x3af   : > { %s2289_s25 = smov %s1795_s26  ;;  %s2290_s26 = smov %s2049_s17 }
 0x3b0   : > { %s2291_s27 = smov %s2038_s11  ;;  %25 = sbr.rel (!%p23_p8) target bundleno = 8 (0x8), region = 117 }
 0x3b7   :  { %1048 = vsyncpa [#allocation3], 1 }
 0x3b8   :  { %1050 = vsyncpa [#allocation3 + $0x1], 1 }
 0x3b9   :  { %1051 = vsyncpa [#allocation6], 1 }
 0x3ba   :  { %1052 = vsyncpa [#allocation9], 1 }
 0x3bb   :  { %1053 = vsyncpa [#allocation12], 1 }
 0x3bc   :  { %1054 = vsyncpa [#allocation4], 1 }
 0x3bd   :  { %1056 = vsyncpa [#allocation4 + $0x1], 1 }

</bundles_post_ra>
